<compile_context>
chip_gen: v7x
topology: tpu7x:2x2x1
jax: 0.10.0
libtpu: 0.0.40
codegen_flags: <defaults>
</compile_context>

<pallas_src>
import functools

import jax
import jax.numpy as jnp
from jax import lax
from jax.experimental import pallas as pl
from jax.experimental.pallas import tpu as pltpu


def _conv1_gemm_kernel(w_ref, b_ref, p_ref, o_ref):
    # w_ref: (Co, K) bf16   b_ref: (Co, 1) f32
    # p_ref: (K, T)  bf16   o_ref: (Co, T) f32   (T = lane-dense spatial tile)
    acc = jnp.dot(w_ref[...], p_ref[...], preferred_element_type=jnp.float32)
    o_ref[...] = (acc + b_ref[...]).astype(o_ref.dtype)


def _pick_tile_hw(hw):
    # Largest lane-dense (multiple-of-128) divisor of Ho*Wo, capped at 2048:
    # keeps double-buffered VMEM tiny on v7x's 64 MiB while amortizing the
    # ~0.35us per-grid-step overhead.  Small inputs fall back to one block.
    for t in (2048, 1024, 512, 256, 128):
        if hw % t == 0:
            return t
    return hw


@functools.partial(jax.jit, static_argnames=("tile_hw",))
def conv1_pallas(x, w, b, *, tile_hw=None):
    """nn.Conv2d(3, 3, kernel_size=5, stride=5) on NCHW input, via Pallas."""
    N, C, H, W = x.shape
    Co, Ci, KH, KW = w.shape
    if C != Ci:
        raise ValueError(f"input channels {C} != weight in-channels {Ci}")
    if H % KH or W % KW:
        raise ValueError(
            f"spatial dims ({H}, {W}) must be multiples of the {KH}x{KW} "
            "kernel (stride == kernel_size, no padding)")
    Ho, Wo = H // KH, W // KW
    K, HW = C * KH * KW, Ho * Wo
    T = _pick_tile_hw(HW) if tile_hw is None else tile_hw
    if HW % T:
        raise ValueError(f"tile_hw={T} must divide Ho*Wo={HW}")

    # Patchify: one fused bf16 convert+transpose (the unavoidable stride-5
    # lane decimation).  Every other layout change here is a free reshape.
    patches = (
        x.astype(jnp.bfloat16)
        .reshape(N, C, Ho, KH, Wo, KW)
        .transpose(0, 1, 3, 5, 2, 4)            # (N, C, KH, KW, Ho, Wo)
        .reshape(N, K, HW)
    )
    wmat = w.reshape(Co, K).astype(jnp.bfloat16)   # (Co, K), VMEM-resident
    bcol = b.reshape(Co, 1).astype(jnp.float32)    # (Co, 1), VMEM-resident

    flops = 2 * N * HW * K * Co
    bytes_accessed = (patches.size * 2 + wmat.size * 2 + bcol.size * 4
                      + N * Co * HW * 4)

    out = pl.pallas_call(
        _conv1_gemm_kernel,
        out_shape=jax.ShapeDtypeStruct((N, Co, HW), jnp.float32),
        grid=(N, HW // T),
        in_specs=[
            pl.BlockSpec((Co, K), lambda n, t: (0, 0)),          # resident W
            pl.BlockSpec((Co, 1), lambda n, t: (0, 0)),          # resident b
            pl.BlockSpec((None, K, T), lambda n, t: (n, 0, t)),  # patch tile
        ],
        out_specs=pl.BlockSpec((None, Co, T), lambda n, t: (n, 0, t)),
        compiler_params=pltpu.CompilerParams(
            dimension_semantics=("parallel", "parallel"),
            vmem_limit_bytes=32 * 1024 * 1024,
        ),
        cost_estimate=pl.CostEstimate(
            flops=flops, transcendentals=0, bytes_accessed=bytes_accessed),
    )(wmat, bcol, patches)

    # (N, Co, Ho*Wo) -> NCHW is a free reshape; no output transpose needed.
    return out.reshape(N, Co, Ho, Wo)


class LipFDPallas:
    """JAX/Pallas port of LipFD.  Only conv1 has defined semantics."""

    def __init__(self, key):
        kw, kb = jax.random.split(key)
        # nn.Conv2d(3, 3, kernel_size=5, stride=5): weight (3,3,5,5), bias (3,)
        fan_in = 3 * 5 * 5
        bound = 1.0 / (fan_in ** 0.5)
        self.conv1_w = jax.random.uniform(
            kw, (3, 3, 5, 5), jnp.float32, -bound, bound)
        self.conv1_b = jax.random.uniform(
            kb, (3,), jnp.float32, -bound, bound)

    def get_features(self, x):
        x = conv1_pallas(x, self.conv1_w, self.conv1_b)
        # TODO(synk): self.encoder.encode_image (clip.load) is an external
        # pretrained CLIP model with no definition in the source; not translatable.
        return x

    def forward(self, x, feature):
        # TODO(synk): self.backbone = get_backbone() is undefined in
        # models/LipFD.py, so forward's semantics cannot be reproduced.
        raise NotImplementedError("get_backbone() is not defined in models/LipFD.py")


def _conv1_reference(x, w, b):
    """Reference: lax conv with stride 5, NCHW/OIHW, f32."""
    out = lax.conv_general_dilated(
        x.astype(jnp.float32),
        w.astype(jnp.float32),
        window_strides=(5, 5),
        padding="VALID",
        dimension_numbers=("NCHW", "OIHW", "NCHW"),
    )
    return out + b.reshape(1, -1, 1, 1)


if __name__ == "__main__":
    key = jax.random.PRNGKey(0)
    k_model, k_x = jax.random.split(key)

    model = LipFDPallas(k_model)

    # small NCHW input consistent with conv1 (3 in-channels, spatial % 5 == 0)
    x = jax.random.normal(k_x, (2, 3, 80, 80), jnp.float32)

    out = jax.block_until_ready(model.get_features(x))        # grid (2, 1)
    ref = jax.block_until_ready(
        _conv1_reference(x, model.conv1_w, model.conv1_b))
    assert out.shape == ref.shape == (2, 3, 16, 16)
    # bf16 kernel inputs -> loosened tolerance vs the f32 reference.
    assert jnp.allclose(out, ref, atol=3e-2, rtol=3e-2)

    # also exercise the multi-tile spatial grid explicitly
    out2 = jax.block_until_ready(
        conv1_pallas(x, model.conv1_w, model.conv1_b, tile_hw=128))  # grid (2, 2)
    assert out2.shape == ref.shape
    assert jnp.allclose(out2, ref, atol=3e-2, rtol=3e-2)

    print("KERNEL_OK")
</pallas_src>

<mosaic_0001>
module attributes {stable_mosaic.version = 11 : i64} {
  func.func @_conv1_gemm_kernel(%arg0: i32, %arg1: i32, %arg2: memref<3x75xbf16, #tpu.memory_space<vmem>>, %arg3: memref<3x1xf32, #tpu.memory_space<vmem>>, %arg4: memref<1x75x256xbf16, #tpu.memory_space<vmem>>, %arg5: memref<1x3x256xf32, #tpu.memory_space<vmem>>) attributes {dimension_semantics = [#tpu.dimension_semantics<parallel>, #tpu.dimension_semantics<parallel>], iteration_bounds = array<i64: 2, 1>, scalar_prefetch = 0 : i64, scratch_operands = 0 : i64, tpu.core_type = #tpu.core_type<tc>, window_params = [{pipeline_mode = #tpu.pipeline_mode<synchronous>, transform_indices = @transform_0, window_bounds = array<i64: 3, 75>}, {pipeline_mode = #tpu.pipeline_mode<synchronous>, transform_indices = @transform_1, window_bounds = array<i64: 3, 1>}, {transform_indices = @transform_2, window_bounds = array<i64: 1, 75, 256>}, {transform_indices = @transform_3, window_bounds = array<i64: 1, 3, 256>}]} {
    %c0 = arith.constant 0 : index
    %c0_0 = arith.constant 0 : index
    %0 = vector.load %arg2[%c0, %c0_0] : memref<3x75xbf16, #tpu.memory_space<vmem>>, vector<3x75xbf16>
    %c0_1 = arith.constant 0 : index
    %c0_2 = arith.constant 0 : index
    %c0_3 = arith.constant 0 : index
    %1 = vector.load %arg4[%c0_1, %c0_2, %c0_3] : memref<1x75x256xbf16, #tpu.memory_space<vmem>>, vector<1x75x256xbf16>
    %2 = vector.shape_cast %1 : vector<1x75x256xbf16> to vector<75x256xbf16>
    %cst = arith.constant dense<0.000000e+00> : vector<3x256xf32>
    %3 = tpu.matmul %0, %2, %cst {dimension_numbers = #tpu.dot_dimension_numbers<[1], [0], [0], [1], [0, 0, 1, 1], [], []>} : vector<3x75xbf16>, vector<75x256xbf16>, vector<3x256xf32> -> vector<3x256xf32>
    %c0_4 = arith.constant 0 : index
    %c0_5 = arith.constant 0 : index
    %4 = vector.load %arg3[%c0_4, %c0_5] : memref<3x1xf32, #tpu.memory_space<vmem>>, vector<3x1xf32>
    %5 = vector.broadcast %4 : vector<3x1xf32> to vector<3x256xf32>
    %6 = arith.addf %3, %5 : vector<3x256xf32>
    %c0_6 = arith.constant 0 : index
    %c0_7 = arith.constant 0 : index
    %c0_8 = arith.constant 0 : index
    %7 = vector.load %arg5[%c0_6, %c0_7, %c0_8] : memref<1x3x256xf32, #tpu.memory_space<vmem>>, vector<1x3x256xf32>
    %8 = vector.shape_cast %7 : vector<1x3x256xf32> to vector<3x256xf32>
    %9 = vector.shape_cast %6 : vector<3x256xf32> to vector<1x3x256xf32>
    tpu.vector_store %arg5[%c0_6, %c0_7, %c0_8], %9 {strides = array<i32>} : memref<1x3x256xf32, #tpu.memory_space<vmem>>, vector<1x3x256xf32>,
    return
  }
  func.func @transform_0(%arg0: i32, %arg1: i32) -> (i32, i32) {
    %c0_i32 = arith.constant 0 : i32
    %c0_i32_0 = arith.constant 0 : i32
    %c0_i32_1 = arith.constant 0 : i32
    return %c0_i32, %c0_i32_0 : i32, i32
  }
  func.func @transform_1(%arg0: i32, %arg1: i32) -> (i32, i32) {
    %c0_i32 = arith.constant 0 : i32
    %c0_i32_0 = arith.constant 0 : i32
    %c0_i32_1 = arith.constant 0 : i32
    return %c0_i32, %c0_i32_0 : i32, i32
  }
  func.func @transform_2(%arg0: i32, %arg1: i32) -> (i32, i32, i32) {
    %c0_i32 = arith.constant 0 : i32
    %c0_i32_0 = arith.constant 0 : i32
    return %arg0, %c0_i32, %arg1 : i32, i32, i32
  }
  func.func @transform_3(%arg0: i32, %arg1: i32) -> (i32, i32, i32) {
    %c0_i32 = arith.constant 0 : i32
    %c0_i32_0 = arith.constant 0 : i32
    return %arg0, %c0_i32, %arg1 : i32, i32, i32
  }
}

</mosaic_0001>

<bundles_post_ra>
// kernel: conv1_pallas.1
= control target key start
LH: loop header
LB: loop body
LE: loop exit
PB: predicated region body
PF: predicated region fallthrough
CT: control target
= control target key end

     0   :  { %s534_s12 = smov 0   ;;  %s536_s13 = smov 0   ;;  %s577_s0 = inlined_call_operand.vmem [shape: bf16[3,75], index: 0, kind: input, shape index: {}]   ;;  %s578_s1 = inlined_call_operand.vmem [shape: f32[3,1], index: 1, kind: input, shape index: {}]   ;;  %s579_s2 = inlined_call_operand.vmem [shape: bf16[2,75,256], index: 2, kind: input, shape index: {}]   ;;  %s580_s3 = inlined_call_operand.vmem [shape: f32[2,3,256], index: 3, kind: output, shape index: {}]  }
   0x1   :  { %s538_s14 = smov 0  }
   0x2 LB: > { %s25_s15 = sadd.s32 1, %s506_s13  ;;  %p427_p0 = scmp.ge.s32.totalorder %s510_s14, 1  ;;  %s510_s14 = sphi %s538_s14, %s13_s14   ;;  %s506_s13 = sphi %s536_s13, %s582_s13   ;;  %s502_s12 = sphi %s534_s12, %s581_s12  }
   0x3   : > { %p27_p1 = scmp.ge.s32.totalorder %s25_s15, 2  ;;  %p158_p2 = scmp.lt.s32.totalorder %s510_s14, 3 }
   0x5   : > { %s584_s15 = smov (%p27_p1, %s25_s15), 0  ;;  %p159_p3 = pnand %p427_p0, %p158_p2 }
   0x6   : > { %p191_p4 = scmp.lt.s32.totalorder (!%p159_p3), %s502_s12, 1  ;;  %v512_v0 = vmov (!%p159_p3), 0   ;;  %v222_v1 = vld [vmem:[%s578_s1] sm:$0x7] (!%p159_p3)  ;;  %vm280_vm0 = vcmask (!%p159_p3), 1044480   ;;  %vm281_vm1 = vcmask (!%p159_p3), 1045504  }
   0x7   : > { %162 = sbr.rel (%p159_p3) target bundleno = 257 (0x101), region = 32  ;;  %322 = vmatprep.mubr.bf16.mxu0 (!%p159_p3), %v512_v0  ;;  %472 = vset.pattern.permute.xlu0 (!%p159_p3), %v512_v0  ;;  %v513_v7 = vmov (!%p159_p3), 65535   ;;  %v211_v17 = vld [vmem:[%s577_s0] sm:$0x3] (!%p159_p3)  ;;  %vm276_vm2 = vcmask (!%p159_p3), 613376  }
   0x8   : > { %225 = vperm.xlu0 (!%p159_p3), %472, %v222_v1   ;;  %v282_v8 = vsel (!%p159_p3), %vm280_vm0, 4294967295, %v513_v7 }
   0x9   : > { %v283_v12 = vsel (!%p159_p3), %vm281_vm1, %v282_v8, 0 }
   0xe   : > { %s586_s12 = smov (!%p191_p4, %s502_s12), 1 }
   0xf   : > { %s445_s18 = smul.u32 80, %s586_s12  ;;  %s444_s24 = sshll.u32 %s586_s12, 3 }
  0x10   : > { %s208_s27 = scalar_lea.vmem %s580_s3, %s444_s24 }
  0x11   : > { %s198_s21 = scalar_lea.vmem %s579_s2, %s445_s18 }
  0x12   : > { %v473_v2 = vld [vmem:[%s198_s21 + $0x4] ss:$8 sps:$4 sm:$0xff]   ;;  %v475_v3 = vld [vmem:[%s198_s21] ss:$8 sps:$4 sm:$0xff]   ;;  %v476_v4 = vld [vmem:[%s198_s21 + $0x14] ss:$8 sps:$4 sm:$0xff]  }
  0x13   : > { %290 = vmatprep.subr.bf16.mxu0 %v473_v2  ;;  %v478_v5 = vld [vmem:[%s198_s21 + $0x10] ss:$8 sps:$4 sm:$0xff]   ;;  %v479_v6 = vld [vmem:[%s198_s21 + $0x24] ss:$8 sps:$4 sm:$0xff]   ;;  %v481_v9 = vld [vmem:[%s198_s21 + $0x20] ss:$8 sps:$4 sm:$0xff]  }
  0x14   : > { %291 = vmatpush1.bf16.msra.mxu0 %v475_v3  ;;  %v482_v10 = vld [vmem:[%s198_s21 + $0x34] ss:$8 sps:$4 sm:$0xff]   ;;  %v485_v11 = vld [vmem:[%s198_s21 + $0x44] ss:$8 sps:$4 sm:$0x3f]  }
  0x15   : > { %292 = vmatprep.subr.bf16.mxu0 %v476_v4  ;;  %v484_v13 = vld [vmem:[%s198_s21 + $0x30] ss:$8 sps:$4 sm:$0xff]   ;;  %v487_v14 = vld [vmem:[%s198_s21 + $0x40] ss:$8 sps:$4 sm:$0x3f]   ;;  %v288_v15 = vand.u32 %v485_v11, %v283_v12 }
  0x16   : > { %v285_v16 = vand.u32 %v487_v14, %v283_v12 }
  0x18   : > { %293 = vmatpush1.bf16.msra.mxu0 %v478_v5 }
  0x19   : > { %294 = vmatprep.subr.bf16.mxu0 %v479_v6 }
  0x1c   : > { %295 = vmatpush1.bf16.msra.mxu0 %v481_v9 }
  0x1d   : > { %296 = vmatprep.subr.bf16.mxu0 %v482_v10 }
  0x20   : > { %297 = vmatpush1.bf16.msra.mxu0 %v484_v13 }
  0x21   : > { %298 = vmatprep.subr.bf16.mxu0 %v288_v15 }
  0x24   : > { %299 = vmatpush1.bf16.msra.mxu0 %v285_v16 }
  0x27   : > { %441 = vmatmul.mubr.msk.bf16.vlgmr.msra.gmra.mrb[0].mxu0 %vm276_vm2, %v211_v17 }
  0x87   : > { %v226_v18 = vpop.permute.xlu0 %225 }
  0xfa   : > { %v324_v19 = vpop.f32.mrb[0].mxu0 }
  0xfb   : > { %v325_v20 = vadd.f32 %v324_v19, %v226_v18  ;;  %v326_v21 = vpop.f32.mrb[1].mxu0 }
  0xfc   : > { %v327_v22 = vadd.f32 %v326_v21, %v226_v18  ;;  %v328_v23 = vpop.f32.mrb[2].mxu0 }
  0xfd   : > { %v329_v24 = vpop.f32.mrb[3].mxu0 }
  0xfe   : > { %v333_v25 = vcombine.low %v325_v20, %v327_v22 }
 0x100   : > { %335 = vst [vmem:[%s208_s27] sm:$0x77] %v333_v25 }
 0x101 PF: > { %s13_s14 = sadd.s32 1, %s510_s14   ;;  %s581_s12 = smov %s506_s13 }
 0x102   : > { %p10_p5 = scmp.ge.s32.totalorder %s13_s14, 4   ;;  %s582_s13 = smov %s584_s15 }
 0x104   :  { %12 = sbr.rel (!%p10_p5) target bundleno = 2 (0x2), region = 62 }

</bundles_post_ra>
